<compile_context>
chip_gen: v7x
topology: tpu7x:2x2x1
jax: 0.10.0
libtpu: 0.0.40
codegen_flags: <defaults>
</compile_context>

<pallas_src>
import functools

import jax
import jax.numpy as jnp
from jax import lax
from jax.experimental import pallas as pl
from jax.experimental.pallas import tpu as pltpu


def _coverage_kernel(pred_ref, tgt_ref, out_ref, *, pth, threshold,
                     valid_rows, g_inner):
    """Fold one (tile_rows, lanes) tile of both inputs into the resident
    (16, lanes) accumulator: rows 0..7 = covered count, rows 8..15 = valid count."""
    c = pl.program_id(0)            # outer axis ("parallel", megacore)
    i = pl.program_id(1)            # inner axis ("arbitrary", reduction)
    tile_rows, lanes = pred_ref.shape
    nblk = tile_rows // 8

    # Global row of this tile's first row, derived from the *unclamped* block
    # index.  For padded grid steps (blk >= real block count) the index_map
    # clamps the DMA onto the last real block, but row0 >= valid_rows here, so
    # every element is masked out and contributes zero.  The same mask also
    # kills stale VMEM rows of a partial last block.
    row0 = (c * g_inner + i) * tile_rows

    @pl.when(i == 0)
    def _():
        out_ref[...] = jnp.zeros_like(out_ref)

    sub = lax.broadcasted_iota(jnp.int32, (8, lanes), 0)   # hoisted out of loop

    def body(j, carry):
        cov_acc, val_acc = carry
        r = pl.multiple_of(j * 8, 8)
        p = pred_ref[pl.ds(r, 8), :]
        t = tgt_ref[pl.ds(r, 8), :]
        row_ok = (row0 + j * 8 + sub) < valid_rows          # tail / pad mask
        pred_bin = (p > pth).astype(jnp.float32)
        tgt_pos = (t > 0) & row_ok                           # valid-target mask
        tgt_bin = tgt_pos.astype(jnp.float32)
        diff = jnp.abs(pred_bin - tgt_bin)
        covered = ((diff < threshold) & tgt_pos).astype(jnp.float32)
        return cov_acc + covered, val_acc + tgt_bin

    zeros = jnp.zeros((8, lanes), jnp.float32)
    cov_acc, val_acc = lax.fori_loop(0, nblk, body, (zeros, zeros),
                                     unroll=min(nblk, 8))

    out_ref[0:8, :] = out_ref[0:8, :] + cov_acc
    out_ref[8:16, :] = out_ref[8:16, :] + val_acc


def _jnp_counts(p, t, pth, threshold):
    """Reference-style counts for the tiny remainder (or very small inputs)."""
    pred_bin = (p > pth).astype(jnp.float32)
    tgt_bin = (t > 0).astype(jnp.float32)
    mask = t > 0
    covered = ((jnp.abs(pred_bin - tgt_bin) < threshold) & mask).astype(jnp.float32)
    return jnp.sum(covered), jnp.sum(tgt_bin)


def coverage_rate(predicted, target, *, pth=0.05, threshold=0.1,
                  max_tile_rows=1024):
    """Pallas CoverageRate. Accepts any matching shapes (e.g. NCHW), any float dtype."""
    assert predicted.shape == target.shape
    # Keep the caller's dtype end-to-end (no wrapper upcast -> no extra HBM
    # traffic); ravel of a contiguous array is a free reshape.
    pred = jnp.ravel(predicted)
    tgt = jnp.ravel(target)
    n = pred.shape[0]

    num_covered = jnp.float32(0.0)
    num_valid = jnp.float32(0.0)

    # Largest lane width (multiple of 128) that still yields >=16 rows.
    lanes = 128
    for cand in (1024, 512, 256):
        if n // cand >= 16:
            lanes = cand
            break
    rows = n // lanes
    main_n = rows * lanes

    if rows >= 8:
        if rows >= 16:
            # Keep at least 2 blocks so the "parallel" outer axis can feed both
            # v7x TensorCores; never let the block exceed the array extent.
            half = (-(-rows // 2) + 7) // 8 * 8
            tile_rows = min(max_tile_rows, half)
        else:
            tile_rows = 8
        g_total = -(-rows // tile_rows)
        num_splits = 2 if g_total >= 2 else 1
        g_inner = -(-g_total // num_splits)

        # Common case (n multiple of lanes): pure reshape, zero extra HBM traffic.
        # Otherwise XLA materializes the prefix slice once (unavoidable for a 2-D view).
        pred2d = (pred if main_n == n else pred[:main_n]).reshape(rows, lanes)
        tgt2d = (tgt if main_n == n else tgt[:main_n]).reshape(rows, lanes)

        kernel = functools.partial(_coverage_kernel, pth=pth, threshold=threshold,
                                   valid_rows=rows, g_inner=g_inner)

        def in_map(c, i):
            # Clamp padded grid steps onto the last real block; the kernel masks
            # their contribution to zero via the global-row check.
            return (jnp.minimum(c * g_inner + i, g_total - 1), 0)

        parts = pl.pallas_call(
            kernel,
            out_shape=jax.ShapeDtypeStruct((num_splits * 16, lanes), jnp.float32),
            grid_spec=pltpu.PrefetchScalarGridSpec(
                num_scalar_prefetch=0,
                grid=(num_splits, g_inner),
                in_specs=[
                    pl.BlockSpec((tile_rows, lanes), in_map),
                    pl.BlockSpec((tile_rows, lanes), in_map),
                ],
                out_specs=pl.BlockSpec((16, lanes), lambda c, i: (c, 0)),
            ),
            compiler_params=pltpu.CompilerParams(
                dimension_semantics=("parallel", "arbitrary"),
                vmem_limit_bytes=32 * 1024 * 1024,
            ),
        )(pred2d, tgt2d)

        parts = parts.reshape(num_splits, 2, 8, lanes)
        num_covered = num_covered + jnp.sum(parts[:, 0])
        num_valid = num_valid + jnp.sum(parts[:, 1])
        tail_start = main_n
    else:
        tail_start = 0   # too small for a useful kernel launch: all-jnp path

    if tail_start < n:
        # < lanes (or tiny-input) remainder: negligible plain-jnp reduction.
        cov_t, val_t = _jnp_counts(pred[tail_start:], tgt[tail_start:], pth, threshold)
        num_covered = num_covered + cov_t
        num_valid = num_valid + val_t

    # TODO(synk): PyTorch returns a Python float via .item(); we return a JAX scalar.
    return jnp.where(num_valid > 0, num_covered / num_valid, jnp.float32(0.0))


def _reference_coverage(predicted, target, pth=0.05, threshold=0.1):
    pred_bin = (predicted > pth).astype(jnp.float32)
    tgt_bin = (target > 0).astype(jnp.float32)
    mask = tgt_bin > 0
    diff = jnp.abs(pred_bin - tgt_bin)
    covered = ((diff < threshold) & mask).astype(jnp.float32)
    num_cov = jnp.sum(covered)
    num_val = jnp.sum(mask.astype(jnp.float32))
    return jnp.where(num_val > 0, num_cov / num_val, jnp.float32(0.0))


if __name__ == "__main__":
    key = jax.random.PRNGKey(0)
    k1, k2 = jax.random.split(key)

    B, C, H, W = 2, 4, 16, 16
    predicted = jax.random.uniform(k1, (B, C, H, W), dtype=jnp.float32)
    # ~30% of target entries are exactly zero (excluded from the valid mask).
    target = jnp.maximum(
        jax.random.uniform(k2, (B, C, H, W), dtype=jnp.float32) - 0.3, 0.0
    )

    rate = coverage_rate(predicted, target)
    rate = jax.block_until_ready(rate)

    ref = jax.block_until_ready(_reference_coverage(predicted, target))
    assert jnp.allclose(rate, ref, rtol=1e-6, atol=1e-6), (rate, ref)

    print("KERNEL_OK")
</pallas_src>

<mosaic_0001>
module attributes {stable_mosaic.version = 11 : i64} {
  func.func @_coverage_kernel(%arg0: i32, %arg1: i32, %arg2: memref<8x128xf32, #tpu.memory_space<vmem>>, %arg3: memref<8x128xf32, #tpu.memory_space<vmem>>, %arg4: memref<16x128xf32, #tpu.memory_space<vmem>>) attributes {dimension_semantics = [#tpu.dimension_semantics<parallel>, #tpu.dimension_semantics<arbitrary>], iteration_bounds = array<i64: 2, 1>, scalar_prefetch = 0 : i64, scratch_operands = 0 : i64, tpu.core_type = #tpu.core_type<tc>, window_params = [{transform_indices = @transform_0, window_bounds = array<i64: 8, 128>}, {transform_indices = @transform_1, window_bounds = array<i64: 8, 128>}, {transform_indices = @transform_2, window_bounds = array<i64: 16, 128>}]} {
    %c1_i32 = arith.constant 1 : i32
    %0 = arith.muli %arg0, %c1_i32 : i32
    %1 = arith.addi %0, %arg1 : i32
    %c8_i32 = arith.constant 8 : i32
    %2 = arith.muli %1, %c8_i32 : i32
    %c0_i32 = arith.constant 0 : i32
    %3 = arith.cmpi eq, %arg1, %c0_i32 : i32
    %4 = arith.extui %3 : i1 to i32
    %c0_i32_0 = arith.constant 0 : i32
    %5 = arith.cmpi ne, %4, %c0_i32_0 : i32
    scf.if %5 {
      %cst_16 = arith.constant 0.000000e+00 : f32
      %44 = vector.broadcast %cst_16 : f32 to vector<16x128xf32>
      %c0_17 = arith.constant 0 : index
      %c0_18 = arith.constant 0 : index
      %45 = vector.load %arg4[%c0_17, %c0_18] : memref<16x128xf32, #tpu.memory_space<vmem>>, vector<16x128xf32>
      tpu.vector_store %arg4[%c0_17, %c0_18], %44 {strides = array<i32>} : memref<16x128xf32, #tpu.memory_space<vmem>>, vector<16x128xf32>,
    } else {
    }
    %6 = tpu.iota {dimensions = array<i32: 0>} : vector<8x128xi32>
    %cst = arith.constant 0.000000e+00 : f32
    %7 = vector.broadcast %cst : f32 to vector<8x128xf32>
    %c0_i32_1 = arith.constant 0 : i32
    %c8_i32_2 = arith.constant 8 : i32
    %8 = arith.muli %c0_i32_1, %c8_i32_2 : i32
    %9 = tpu.assume_multiple %8, 8 : i32
    %10 = arith.index_cast %9 : i32 to index
    %c0 = arith.constant 0 : index
    %11 = vector.load %arg2[%10, %c0] : memref<8x128xf32, #tpu.memory_space<vmem>>, vector<8x128xf32>
    %12 = arith.index_cast %9 : i32 to index
    %c0_3 = arith.constant 0 : index
    %13 = vector.load %arg3[%12, %c0_3] : memref<8x128xf32, #tpu.memory_space<vmem>>, vector<8x128xf32>
    %c8_i32_4 = arith.constant 8 : i32
    %14 = arith.muli %c0_i32_1, %c8_i32_4 : i32
    %15 = arith.addi %2, %14 : i32
    %16 = vector.broadcast %15 : i32 to vector<8x128xi32>
    %17 = arith.addi %16, %6 : vector<8x128xi32>
    %c16_i32 = arith.constant 16 : i32
    %18 = vector.broadcast %c16_i32 : i32 to vector<8x128xi32>
    %19 = arith.cmpi slt, %17, %18 : vector<8x128xi32>
    %cst_5 = arith.constant 5.000000e-02 : f32
    %20 = vector.broadcast %cst_5 : f32 to vector<8x128xf32>
    %21 = arith.cmpf ogt, %11, %20 : vector<8x128xf32>
    %22 = arith.extui %21 : vector<8x128xi1> to vector<8x128xi32>
    %23 = arith.sitofp %22 : vector<8x128xi32> to vector<8x128xf32>
    %cst_6 = arith.constant 0.000000e+00 : f32
    %24 = vector.broadcast %cst_6 : f32 to vector<8x128xf32>
    %25 = arith.cmpf ogt, %13, %24 : vector<8x128xf32>
    %26 = arith.andi %25, %19 : vector<8x128xi1>
    %27 = arith.extui %26 : vector<8x128xi1> to vector<8x128xi32>
    %28 = arith.sitofp %27 : vector<8x128xi32> to vector<8x128xf32>
    %29 = arith.subf %23, %28 : vector<8x128xf32>
    %30 = math.absf %29 : vector<8x128xf32>
    %cst_7 = arith.constant 1.000000e-01 : f32
    %31 = vector.broadcast %cst_7 : f32 to vector<8x128xf32>
    %32 = arith.cmpf olt, %30, %31 : vector<8x128xf32>
    %33 = arith.andi %32, %26 : vector<8x128xi1>
    %34 = arith.extui %33 : vector<8x128xi1> to vector<8x128xi32>
    %35 = arith.sitofp %34 : vector<8x128xi32> to vector<8x128xf32>
    %36 = arith.addf %7, %35 : vector<8x128xf32>
    %37 = arith.addf %7, %28 : vector<8x128xf32>
    %c1_i32_8 = arith.constant 1 : i32
    %c0_9 = arith.constant 0 : index
    %c0_10 = arith.constant 0 : index
    %38 = vector.load %arg4[%c0_9, %c0_10] : memref<16x128xf32, #tpu.memory_space<vmem>>, vector<8x128xf32>
    %39 = arith.addf %38, %36 : vector<8x128xf32>
    %c0_11 = arith.constant 0 : index
    %c0_12 = arith.constant 0 : index
    %40 = vector.load %arg4[%c0_11, %c0_12] : memref<16x128xf32, #tpu.memory_space<vmem>>, vector<8x128xf32>
    tpu.vector_store %arg4[%c0_11, %c0_12], %39 {strides = array<i32>} : memref<16x128xf32, #tpu.memory_space<vmem>>, vector<8x128xf32>,
    %c8 = arith.constant 8 : index
    %c0_13 = arith.constant 0 : index
    %41 = vector.load %arg4[%c8, %c0_13] : memref<16x128xf32, #tpu.memory_space<vmem>>, vector<8x128xf32>
    %42 = arith.addf %41, %37 : vector<8x128xf32>
    %c8_14 = arith.constant 8 : index
    %c0_15 = arith.constant 0 : index
    %43 = vector.load %arg4[%c8_14, %c0_15] : memref<16x128xf32, #tpu.memory_space<vmem>>, vector<8x128xf32>
    tpu.vector_store %arg4[%c8_14, %c0_15], %42 {strides = array<i32>} : memref<16x128xf32, #tpu.memory_space<vmem>>, vector<8x128xf32>,
    return
  }
  func.func @transform_0(%arg0: i32, %arg1: i32) -> (i32, i32) {
    %c1_i32 = arith.constant 1 : i32
    %0 = arith.muli %arg0, %c1_i32 : i32
    %1 = arith.addi %0, %arg1 : i32
    %c1_i32_0 = arith.constant 1 : i32
    %2 = arith.minsi %1, %c1_i32_0 : i32
    %c0_i32 = arith.constant 0 : i32
    %c0_i32_1 = arith.constant 0 : i32
    return %2, %c0_i32 : i32, i32
  }
  func.func @transform_1(%arg0: i32, %arg1: i32) -> (i32, i32) {
    %c1_i32 = arith.constant 1 : i32
    %0 = arith.muli %arg0, %c1_i32 : i32
    %1 = arith.addi %0, %arg1 : i32
    %c1_i32_0 = arith.constant 1 : i32
    %2 = arith.minsi %1, %c1_i32_0 : i32
    %c0_i32 = arith.constant 0 : i32
    %c0_i32_1 = arith.constant 0 : i32
    return %2, %c0_i32 : i32, i32
  }
  func.func @transform_2(%arg0: i32, %arg1: i32) -> (i32, i32) {
    %c0_i32 = arith.constant 0 : i32
    %c0_i32_0 = arith.constant 0 : i32
    return %arg0, %c0_i32 : i32, i32
  }
}

</mosaic_0001>

<bundles_post_ra>
// kernel: tpu_custom_call.1
= control target key start
LH: loop header
LB: loop body
LE: loop exit
PB: predicated region body
PF: predicated region fallthrough
CT: control target
= control target key end

     0   :  { %7 = vsyncpa [#allocation3], 0  ;;  %s951_s0 = inlined_call_operand.hbm [shape: f32[16,128], index: 0, kind: input, shape index: {}]   ;;  %s952_s1 = inlined_call_operand.hbm [shape: f32[16,128], index: 1, kind: input, shape index: {}]   ;;  %s953_s2 = inlined_call_operand.hbm [shape: f32[32,128], index: 2, kind: output, shape index: {}]  }
   0x1   :  { %9 = vsyncpa [#allocation3 + $0x1], 0 }
   0x2   :  { %10 = vsyncpa [#allocation6], 0 }
   0x3   :  { %12 = vsyncpa [#allocation6 + $0x1], 0 }
   0x4   :  { %13 = vsyncpa [#allocation4], 0 }
   0x5   :  { %15 = vsyncpa [#allocation4 + $0x1], 0  ;;  %s696_s9 = smov 0   ;;  %s698_s10 = smov 0  }
   0x6   :  { %s700_s11 = smov 0   ;;  %s702_s12 = smov 0  }
   0x7   :  { %s704_s13 = smov 0   ;;  %s706_s14 = smov 0  }
   0x8   :  { %s708_s15 = smov 0   ;;  %s710_s16 = smov 0  }
   0x9   :  { %s712_s17 = smov 0  }
   0xa LB: > { %s387_s18 = sadd.s32 4294967295, %s673_s17   ;;  %s388_s19 = sadd.s32 4294967294, %s673_s17   ;;  %s673_s17 = sphi %s712_s17, %s21_s17   ;;  %s669_s16 = sphi %s710_s16, %s978_s16   ;;  %s665_s15 = sphi %s708_s15, %s977_s15   ;;  %s661_s14 = sphi %s706_s14, %s976_s14   ;;  %s657_s13 = sphi %s704_s13, %s975_s13   ;;  %s653_s12 = sphi %s702_s12, %s974_s12   ;;  %s649_s11 = sphi %s700_s11, %s973_s11   ;;  %s645_s10 = sphi %s698_s10, %s972_s10   ;;  %s641_s9 = sphi %s696_s9, %s971_s9  }
   0xb   : > { %s33_s20 = sadd.s32 1, %s669_s16  ;;  %p38_p0 = scmp.lt.s32.totalorder %s669_s16, 1 }
   0xc   : > { %p35_p1 = scmp.ge.s32.totalorder %s33_s20, 2  ;;  %s46_s21 = sadd.s32 1, %s661_s14 }
   0xd   : > { %s745_s22 = scalar_select %p38_p0, %s669_s16, 1 }
   0xe   : > { %s980_s20 = smov (%p35_p1, %s33_s20), 0  ;;  %p53_p2 = scmp.ne.s32.totalorder %s661_s14, %s657_s13 }
   0xf   : > { %p54_p3 = scmp.eq.s32.totalorder %s673_s17, 0  ;;  %p41_p4 = scmp.lt.s32.totalorder %s980_s20, 1 }
  0x10   : > { %p59_p5 = scmp.ne.s32.totalorder %s657_s13, %s653_s12  ;;  %p60_p7 = scmp.eq.s32.totalorder %s387_s18, 0 }
  0x11   : > { %p754_p6 = por %p54_p3, %p53_p2  ;;  %s101_s26 = ssub.s32 %s669_s16, %s980_s20 }
  0x12   : > { %s42_s24 = scalar_select %p41_p4, %s980_s20, 1 }
  0x13   : > { %p759_p8 = por %p60_p7, %p59_p5  ;;  %p102_p9 = scmp.eq.s32.totalorder %s101_s26, 0 }
  0x14   : > { %s43_s27 = ssub.s32 %s745_s22, %s42_s24  ;;  %s104_s28 = sadd.s32 1, %s649_s11 }
  0x15   : > { %s958_s25 = scalar_select %p759_p8, 1, 0 }
  0x16   : > { %p44_p10 = scmp.eq.s32.totalorder %s43_s27, 0  ;;  %p114_p11 = scmp.ne.s32.totalorder %s649_s11, %s645_s10 }
  0x17   : > { %s768_s29 = scalar_select %p102_p9, %s649_s11, %s104_s28  }
  0x18   : > { %s771_s30 = scalar_select %p44_p10, %s661_s14, %s46_s21  }
  0x19   : > { %p115_p12 = scmp.eq.s32.totalorder %s387_s18, 1  ;;  %p120_p13 = scmp.ne.s32.totalorder %s645_s10, %s641_s9 }
  0x1a   : > { %p121_p0 = scmp.eq.s32.totalorder %s388_s19, 1  ;;  %p426_p4 = scmp.lt.s32.totalorder %s673_s17, 2 }
  0x1b   : > { %p777_p1 = por %p115_p12, %p114_p11  ;;  %s788_s5 = sand.u32 1, %s661_s14  }
  0x1c   : > { %p782_p3 = por %p121_p0, %p120_p13  ;;  %s392_s6 = sshll.u32 %s745_s22, 7 }
  0x1d   : > { %s959_s3 = scalar_select %p777_p1, 1, 0 }
  0x1e   : > { %s960_s4 = scalar_select %p782_p3, 1, 0 }
  0x1f   : > { %s954_s7 = sshll.u32 %s788_s5, 3  ;;  %s797_s18 = scalar_lea.hbm %s951_s0, %s392_s6 }
  0x20   : > { %s145_s19 = scalar_lea.vmem [#allocation2], %s954_s7  ;;  %p803_p5 = pnand %p426_p4, %p754_p6 }
  0x21   : > { %s155_s21 = sshll.u32 %s145_s19, 4  ;;  %s142_s26 = scalar_lea.sflag [#allocation3], %s788_s5  ;;  %s807_s21 = int_to_ptr.vmem [resolvable:$true] %s155_s21 }
  0x22   : > { %s503_s27 = scalar_lea.hbm %s797_s18, 128  ;;  %p505_p11 = pneg %p803_p5 }
  0x23   : > { %p504_p10 = scmp.ne.s32.totalorder %s797_s18, %s503_s27  ;;  %s508_s8 = scalar_lea.hbm %s951_s0, 256 }
  0x24   : > { %p509_p6 = scmp.lt.u32.totalorder %s797_s18, %s951_s0  ;;  %p510_p0 = scmp.lt.u32.totalorder %s508_s8, %s503_s27 }
  0x25   : > { %p506_p12 = pnand %p505_p11, %p504_p10  ;;  %p512_p2 = scmp.lt.u32.totalorder %s503_s27, %s797_s18 }
  0x26   : > { %p511_p4 = por %p510_p0, %p509_p6 }
  0x27   : > { %p507_p13 = pneg %p506_p12 }
  0x28   : > { %p513_p7 = por %p512_p2, %p511_p4 }
  0x2a   : > { %p514_p9 = pnand %p513_p7, %p507_p13 }
  0x2c   : > { %517 = shalt.err (!%p514_p9)
}
  0x2d   : > { %s518_s7 = scalar_lea.vmem %s807_s21, 128  ;;  %s675_s23 = smov [#allocation2]  }
  0x2e   : > { %p519_p10 = scmp.ne.s32.totalorder %s807_s21, %s518_s7  ;;  %s523_s28 = sshll.u32 %s675_s23, 4  ;;  %s524_s28 = int_to_ptr.vmem [resolvable:$false] %s523_s28 }
  0x2f   : > { %s525_s12 = scalar_lea.vmem %s524_s28, 256  ;;  %p526_p1 = scmp.lt.s32.totalorder %s807_s21, %s524_s28 }
  0x30   : > { %p521_p12 = pnand %p519_p10, %p505_p11  ;;  %p527_p6 = scmp.lt.s32.totalorder %s525_s12, %s518_s7 }
  0x32   : > { %p522_p3 = pneg %p521_p12  ;;  %p528_p0 = por %p527_p6, %p526_p1 }
  0x34   : > { %p529_p2 = pnand %p528_p0, %p522_p3 }
  0x36   : > { %532 = shalt.err (!%p529_p2)
}
  0x37   : > { %418 = dma.hbm_to_vmem [thread:$0]  (!%p803_p5), %s797_s18, 128, %s807_s21, %s142_s26  }
  0x38   : > { %p962_p7 = scmp.lt.s32.totalorder %s673_s17, 3  ;;  %p963_p9 = scmp.ge.s32.totalorder %s673_s17, 1 }
  0x39   : > { %s850_s19 = scalar_lea.hbm %s952_s1, %s392_s6  ;;  %s965_s23 = sshll.u32 %s788_s5, 3 }
  0x3a   : > { %p841_p13 = pnand %p963_p9, %p962_p7  ;;  %s166_s28 = scalar_lea.vmem [#allocation5], %s965_s23 }
  0x3b   : > { %s176_s12 = sshll.u32 %s166_s28, 4  ;;  %s163_s18 = scalar_lea.sflag [#allocation6], %s788_s5  ;;  %s177_s12 = int_to_ptr.vmem [resolvable:$true] %s176_s12 }
  0x3c   : > { %s964_s27 = scalar_select %p841_p13, 1, 0 }
  0x3d   : > { %s533_s21 = scalar_lea.hbm %s850_s19, 128  ;;  %s538_s6 = scalar_lea.hbm %s952_s1, 256 }
  0x3e   : > { %p534_p1 = scmp.ne.s32.totalorder %s850_s19, %s533_s21  ;;  %p539_p10 = scmp.lt.u32.totalorder %s850_s19, %s952_s1 }
  0x3f   : > { %p540_p12 = scmp.lt.u32.totalorder %s538_s6, %s533_s21  ;;  %p542_p0 = scmp.lt.u32.totalorder %s533_s21, %s850_s19 }
  0x40   : > { %p536_p3 = pnand %p534_p1, %p505_p11 }
  0x41   : > { %p541_p6 = por %p540_p12, %p539_p10 }
  0x42   : > { %p537_p4 = pneg %p536_p3 }
  0x43   : > { %p543_p2 = por %p542_p0, %p541_p6 }
  0x45   : > { %p544_p7 = pnand %p543_p2, %p537_p4 }
  0x47   : > { %547 = shalt.err (!%p544_p7)
}
  0x48   : > { %s548_s5 = scalar_lea.vmem %s177_s12, 128  ;;  %s676_s23 = smov [#allocation5]  }
  0x49   : > { %p549_p9 = scmp.ne.s32.totalorder %s177_s12, %s548_s5  ;;  %s553_s28 = sshll.u32 %s676_s23, 4  ;;  %s554_s28 = int_to_ptr.vmem [resolvable:$false] %s553_s28 }
  0x4a   : > { %s555_s22 = scalar_lea.vmem %s554_s28, 256  ;;  %p556_p8 = scmp.lt.s32.totalorder %s177_s12, %s554_s28 }
  0x4b   : > { %p551_p1 = pnand %p549_p9, %p505_p11  ;;  %p557_p13 = scmp.lt.s32.totalorder %s555_s22, %s548_s5 }
  0x4d   : > { %p552_p3 = pneg %p551_p1  ;;  %p558_p10 = por %p557_p13, %p556_p8 }
  0x4f   : > { %p559_p12 = pnand %p558_p10, %p552_p3 }
  0x51   : > { %562 = shalt.err (!%p559_p12)
}
  0x52   : > { %421 = dma.hbm_to_vmem [thread:$0]  (!%p803_p5), %s850_s19, 128, %s177_s12, %s163_s18  }
  0x53   : > { %p966_p4 = scmp.ne.s32.totalorder %s964_s27, 0 }
  0x54   : > { %s187_s21 = sand.u32 (!%p966_p4), 1, %s657_s13   ;;  %p967_p11 = scmp.ne.s32.totalorder (!%p966_p4), %s958_s25, 0 }
  0x55   : > { %185 = sbr.rel (%p966_p4) target bundleno = 126 (0x7e), region = 28  ;;  %s396_s26 = sshll.u32 (!%p966_p4), %s187_s21, 3 }
  0x56   : > { %s188_s6 = scalar_lea.sflag (!%p966_p4), [#allocation3], %s187_s21  ;;  %s191_s7 = scalar_lea.vmem (!%p966_p4), [#allocation2], %s396_s26 }
  0x5c   : > { %628 = dma.done.wait (%p967_p11), %s188_s6, 128  }
  0x5d   : > { %630 = vsyncadd (%p967_p11), %s188_s6, 4294967168  ;;  %s197_s8 = scalar_lea.sflag [#allocation6], %s187_s21  ;;  %s200_s5 = scalar_lea.vmem [#allocation5], %s396_s26 }
  0x5e   : > { %632 = dma.done.wait (%p967_p11), %s197_s8, 128  }
  0x5f   : > { %634 = vsyncadd (%p967_p11), %s197_s8, 4294967168  ;;  %s399_s24 = sshll.u32 %s665_s15, 3  ;;  %v241_v0 = vlaneseq  ;;  %s223_s27 = sand.u32 1, %s645_s10   ;;  %v243_v4 = vld [vmem:[%s191_s7] sm:$0xff]  ;;  %v244_v5 = vld [vmem:[%s200_s5] sm:$0xff]  ;;  %v677_v6 = vmov 0.0  }
  0x60   : > { %v245_v1 = vstv %s399_s24  ;;  %s398_s19 = sshll.u32 %s223_s27, 4  ;;  %vm248_vm1 = vcmp.gt.f32.partialorder %v243_v4, 0.05  ;;  %vm251_vm2 = vcmp.gt.f32.partialorder %v244_v5, 0.0  ;;  %s408_s12 = sshll.u32 %s665_s15, 8 }
  0x61   : > { %v242_v2 = vshrl.u32 %v241_v0, 7  ;;  %v400_v7 = vsel %vm248_vm1, 1.0, %v677_v6  ;;  %s225_s25 = scalar_lea.vmem [#allocation7], %s398_s19  ;;  %s891_s22 = scalar_lea.hbm %s953_s2, %s408_s12 }
  0x62   : > { %s283_s18 = sshll.u32 %s225_s25, 4  ;;  %s895_s21 = scalar_lea.sflag [#allocation4], %s223_s27  ;;  %s893_s18 = int_to_ptr.vmem [resolvable:$true] %s283_s18 }
  0x63   : > { %v246_v3 = vadd.s32 %v245_v1, %v242_v2  ;;  %s563_s26 = scalar_lea.vmem %s893_s18, 256  ;;  %p968_p5 = scmp.ne.s32.totalorder %s959_s3, 0 }
  0x64   : > { %p564_p8 = scmp.ne.s32.totalorder %s893_s18, %s563_s26  ;;  %s678_s15 = smov [#allocation7]  }
  0x65   : > { %vm247_vm0 = vcmp.lt.s32.totalorder %v246_v3, 16  ;;  %s567_s6 = sshll.u32 %s678_s15, 4  ;;  %s568_s6 = int_to_ptr.vmem [resolvable:$false] %s567_s6 }
  0x66   : > { %vm252_vm3 = vmand %vm251_vm2, %vm247_vm0  ;;  %p565_p13 = pnand %p564_p8, %p968_p5  ;;  %s569_s7 = scalar_lea.vmem %s568_s6, 512 }
  0x67   : > { %v401_v8 = vsel %vm252_vm3, 1.0, %v677_v6  ;;  %p570_p0 = scmp.lt.s32.totalorder %s893_s18, %s568_s6  ;;  %p571_p2 = scmp.lt.s32.totalorder %s569_s7, %s563_s26 }
  0x68   : > { %v255_v9 = vsub.f32 %v400_v7, %v401_v8  ;;  %268 = vst [vmem:[%s225_s25 + $0x8] sm:$0xff] %v401_v8  ;;  %p566_p6 = pneg %p565_p13 }
  0x69   : > { %p572_p7 = por %p571_p2, %p570_p0 }
  0x6a   : > { %v256_v10 = vand.u32 2147483647, %v255_v9 }
  0x6b   : > { %p573_p9 = pnand %p572_p7, %p566_p6 }
  0x6c   : > { %vm257_vm4 = vcmp.lt.f32.partialorder %v256_v10, 0.1 }
  0x6d   : > { %vm258_vm5 = vmand %vm257_vm4, %vm252_vm3 }
  0x6e   : > { %v402_v11 = vsel %vm258_vm5, 1.0, %v677_v6 }
  0x6f   : > { %265 = vst [vmem:[%s225_s25] sm:$0xff] %v402_v11 }
  0x70   : > { %576 = shalt.err (!%p573_p9)
}
  0x71   : > { %s577_s8 = scalar_lea.hbm %s891_s22, 256  ;;  %s581_s27 = scalar_lea.hbm %s953_s2, 512 }
  0x72   : > { %p578_p1 = scmp.ne.s32.totalorder %s891_s22, %s577_s8  ;;  %p582_p12 = scmp.lt.u32.totalorder %s891_s22, %s953_s2 }
  0x73   : > { %p583_p4 = scmp.lt.u32.totalorder %s581_s27, %s577_s8  ;;  %p585_p8 = scmp.lt.u32.totalorder %s577_s8, %s891_s22 }
  0x74   : > { %p579_p3 = pnand %p578_p1, %p968_p5 }
  0x75   : > { %p584_p11 = por %p583_p4, %p582_p12 }
  0x76   : > { %p580_p10 = pneg %p579_p3 }
  0x77   : > { %p586_p13 = por %p585_p8, %p584_p11 }
  0x79   : > { %p587_p6 = pnand %p586_p13, %p580_p10 }
  0x7b   : > { %590 = shalt.err (!%p587_p6)
}
  0x7c   : > { %s679_s12 = smov 128   ;;  %s680_s23 = smov 8  }
  0x7d   : > { %413 = dma.vmem_to_hbm [thread:$0]  (%p968_p5), %s893_s18, 256, %s891_s22, %s895_s21, %s679_s12, %s679_s12, %s680_s23  }
  0x7e PF: > { %s298_s28 = sand.u32 1, %s641_s9   ;;  %p969_p0 = scmp.ne.s32.totalorder %s960_s4, 0 }
  0x7f   : > { %p970_p2 = scmp.ge.s32.totalorder %s673_s17, 2  ;;  %s299_s26 = scalar_lea.sflag [#allocation4], %s298_s28 }
  0x81   : > { %p423_p7 = pnand %p970_p2, %p969_p0 }
  0x83   : > { %636 = dma.done.wait (!%p423_p7), %s299_s26, 256  }
  0x84   : > { %638 = vsyncadd (!%p423_p7), %s299_s26, 4294967040  ;;  %s21_s17 = sadd.s32 1, %s673_s17   ;;  %s971_s9 = smov %s645_s10 }
  0x85   : > { %p18_p9 = scmp.ge.s32.totalorder %s21_s17, 4   ;;  %s972_s10 = smov %s649_s11 }
  0x86   : > { %s973_s11 = smov %s768_s29  ;;  %s974_s12 = smov %s657_s13 }
  0x87   : > { %s975_s13 = smov %s661_s14  ;;  %s976_s14 = smov %s771_s30 }
  0x88   : > { %s977_s15 = smov %s669_s16  ;;  %s978_s16 = smov %s980_s20 }
  0x89   :  { %20 = sbr.rel (!%p18_p9) target bundleno = 10 (0xa), region = 90 }
  0x90   :  { %304 = vsyncpa [#allocation3], 1 }
  0x91   :  { %306 = vsyncpa [#allocation3 + $0x1], 1 }
  0x92   :  { %307 = vsyncpa [#allocation6], 1 }
  0x93   :  { %309 = vsyncpa [#allocation6 + $0x1], 1 }
  0x94   :  { %310 = vsyncpa [#allocation4], 1 }
  0x95   :  { %312 = vsyncpa [#allocation4 + $0x1], 1 }

</bundles_post_ra>
